<compile_context>
chip_gen: v7x
topology: tpu7x:2x2x1
jax: 0.10.0
libtpu: 0.0.40
codegen_flags: <defaults>
</compile_context>

<pallas_src>
import functools

import jax
import jax.numpy as jnp
from jax.experimental import pallas as pl
from jax.experimental.pallas import tpu as pltpu


_ROW_GRANULE = 16            # bf16 native sublane tiling is (16, 128)
_MAX_ROW_TILE = 2048

# Runtime-config cache: whether pl.Buffered(1) (single-buffered constant
# weight blocks) is accepted by the current JAX/Mosaic build.
_CFG = {"single_buffer_weights": True}


def _round_up(x: int, m: int) -> int:
    return ((x + m - 1) // m) * m


def _physical_vmem_bytes() -> int:
    """Per-generation VMEM capacity; conservative fallback = v7x (64 MiB/TC)."""
    try:
        cap = int(pltpu.get_tpu_info().vmem_capacity_bytes)
        if cap > 0:
            return cap
    except Exception:
        pass
    return 64 * 1024 * 1024


def _tensorcores_per_chip() -> int:
    """Best-effort TC-per-chip query; defaults to 1 (v5e/v6e)."""
    try:
        info = pltpu.get_tpu_info()
        for attr in ("num_tensorcores", "tensorcore_count", "num_cores",
                     "cores_per_chip"):
            v = getattr(info, attr, None)
            if isinstance(v, int) and v > 0:
                return v
    except Exception:
        pass
    try:
        if "v7" in jax.devices()[0].device_kind.lower():
            return 2
    except Exception:
        pass
    return 1


def _mlp_kernel(*refs, num_layers: int, sigmoid_output: bool):
    # refs = (x_ref, w0, b0, w1, b1, ..., w_{L-1}, b_{L-1}, o_ref)
    x_ref = refs[0]
    o_ref = refs[-1]
    params = refs[1:-1]

    compute_dtype = params[0].dtype            # weights' dtype (bf16 default)
    h = x_ref[...].astype(compute_dtype)       # in-kernel cast (no extra pass)
    for i in range(num_layers):
        w = params[2 * i][...]                 # [in_i, out_i]
        b = params[2 * i + 1][...]             # f32 [1, out_i]
        acc = jnp.dot(h, w, preferred_element_type=jnp.float32) + b
        if i < num_layers - 1:
            # ReLU in f32 (v5e has no bf16 VPU), then back to MXU input dtype.
            h = jnp.maximum(acc, 0.0).astype(compute_dtype)
        else:
            h = acc                            # final layer output stays f32
    if sigmoid_output:
        h = jax.nn.sigmoid(h)
    o_ref[...] = h.astype(o_ref.dtype)


def prepare_mlp_params(weights, biases, *, compute_dtype=jnp.bfloat16):
    """One-time parameter prep (hoisted out of mlp_forward).

    weights: list of [in_i, out_i] f32 arrays (transposed vs. PyTorch).
    biases:  list of [out_i] f32 arrays.
    Returns (weights cast to compute_dtype, biases as (1, out_i) f32).
    """
    w_prep = [jnp.asarray(w, compute_dtype) for w in weights]
    b_prep = [jnp.asarray(b, jnp.float32).reshape(1, -1) for b in biases]
    return w_prep, b_prep


def mlp_forward(x, weights, biases, *, sigmoid_output=False, row_tile=None,
                out_dtype=None):
    """Fused MLP: relu(x @ W0 + b0) -> ... -> x @ W_{L-1} + b_{L-1} [-> sigmoid].

    x:       [N, input_dim] (f32, fed unpadded)
    weights: prepared weights from prepare_mlp_params ([in_i, out_i])
    biases:  prepared biases from prepare_mlp_params ((1, out_i) f32)
    """
    num_layers = len(weights)
    n_rows, in_dim = x.shape
    assert weights[0].shape[0] == in_dim
    out_dim = weights[-1].shape[1]
    out_dtype = x.dtype if out_dtype is None else jnp.dtype(out_dtype)
    out_itemsize = jnp.dtype(out_dtype).itemsize
    dims_out = [w.shape[1] for w in weights]
    max_feat = max([in_dim] + dims_out)

    single_buffer = _CFG["single_buffer_weights"]

    weight_bytes = (sum(int(w.size) * w.dtype.itemsize for w in weights)
                    + sum(int(b.size) * 4 for b in biases))
    resident_weight_bytes = weight_bytes * (1 if single_buffer else 2)

    # ---------------- generation-aware VMEM guard -> row tile ----------------
    vmem_cap = _physical_vmem_bytes()
    vmem_limit = min(int(vmem_cap * 3 // 4), 100 * 1024 * 1024)

    if row_tile is None:
        # x / out tiles are double-buffered by the pipeline; intermediate
        # activations are f32 (+ a bf16 working copy).  Generous estimate.
        per_row = (2 * x.dtype.itemsize * in_dim
                   + 2 * out_itemsize * out_dim
                   + 6 * 4 * max_feat)
        budget = vmem_limit - resident_weight_bytes - (1 << 20)
        t = max(budget // max(per_row, 1), _ROW_GRANULE)
        t = min(t, _MAX_ROW_TILE, _round_up(n_rows, _ROW_GRANULE))
        n_tc = _tensorcores_per_chip()
        if n_tc > 1 and n_rows >= 2 * _ROW_GRANULE:
            # keep >= n_tc grid steps so ("parallel",) feeds every TensorCore.
            t = min(t, _round_up(pl.cdiv(n_rows, n_tc), _ROW_GRANULE))
        row_tile = int(max((t // _ROW_GRANULE) * _ROW_GRANULE, _ROW_GRANULE))

    n_pad_rows = _round_up(n_rows, row_tile)
    x_in = x if n_pad_rows == n_rows else jnp.pad(
        x, ((0, n_pad_rows - n_rows), (0, 0)))
    grid = (n_pad_rows // row_tile,)

    flat_params = []
    for w, b in zip(weights, biases):
        flat_params.extend([w, b])

    # ---------------- cost estimate ------------------------------------------
    flops = 2 * n_pad_rows * sum(w.shape[0] * w.shape[1] for w in weights)
    transcendentals = n_pad_rows * out_dim if sigmoid_output else 0
    bytes_accessed = (int(x_in.size) * x.dtype.itemsize + weight_bytes
                      + n_pad_rows * out_dim * out_itemsize)
    cost = pl.CostEstimate(flops=int(flops),
                           transcendentals=int(transcendentals),
                           bytes_accessed=int(bytes_accessed))

    kernel = functools.partial(_mlp_kernel, num_layers=num_layers,
                               sigmoid_output=sigmoid_output)

    def _run(use_single_buffer):
        # x: unpadded f32, full-extent last dim (< 128 lanes is legal).
        in_specs = [pl.BlockSpec((row_tile, in_dim), lambda i: (i, 0))]
        for w, b in zip(weights, biases):
            if use_single_buffer:
                # Constant index_map: the block never changes across the grid,
                # so one VMEM buffer suffices (no double-buffering cost).
                in_specs.append(pl.BlockSpec(w.shape, lambda i: (0, 0),
                                             pipeline_mode=pl.Buffered(1)))
                in_specs.append(pl.BlockSpec(b.shape, lambda i: (0, 0),
                                             pipeline_mode=pl.Buffered(1)))
            else:
                in_specs.append(pl.BlockSpec(w.shape, lambda i: (0, 0)))
                in_specs.append(pl.BlockSpec(b.shape, lambda i: (0, 0)))
        # Output written at its real width: no over-wide stores, no post-slice.
        out_specs = pl.BlockSpec((row_tile, out_dim), lambda i: (i, 0))
        call = pl.pallas_call(
            kernel,
            out_shape=jax.ShapeDtypeStruct((n_pad_rows, out_dim), out_dtype),
            grid_spec=pltpu.PrefetchScalarGridSpec(
                num_scalar_prefetch=0,
                grid=grid,
                in_specs=in_specs,
                out_specs=out_specs,
            ),
            compiler_params=pltpu.CompilerParams(
                dimension_semantics=("parallel",),
                vmem_limit_bytes=int(vmem_limit),
            ),
            cost_estimate=cost,
        )
        return call(x_in, *flat_params)

    if single_buffer:
        try:
            out = _run(True)
        except Exception:
            # This JAX/Mosaic build rejects buffer_count=1; fall back to the
            # default double-buffered constant blocks (identical semantics).
            _CFG["single_buffer_weights"] = False
            out = _run(False)
    else:
        out = _run(False)

    return out if n_pad_rows == n_rows else out[:n_rows]


def init_mlp_params(key, input_dim, hidden_dim, output_dim, num_layers):
    """Deterministic init mirroring nn.Linear (stored transposed [in, out])."""
    h = [hidden_dim] * (num_layers - 1)
    dims_in = [input_dim] + h
    dims_out = h + [output_dim]
    weights, biases = [], []
    for n_in, n_out in zip(dims_in, dims_out):
        key, kw, kb = jax.random.split(key, 3)
        bound = 1.0 / jnp.sqrt(n_in)
        weights.append(jax.random.uniform(kw, (n_in, n_out), jnp.float32,
                                          -bound, bound))
        biases.append(jax.random.uniform(kb, (n_out,), jnp.float32,
                                         -bound, bound))
    return weights, biases


if __name__ == "__main__":
    # Small shapes consistent with the module: 3-layer MLP over [N, input_dim].
    input_dim, hidden_dim, output_dim, num_layers = 32, 64, 16, 3
    n_rows = 64

    key = jax.random.PRNGKey(0)
    key, kx = jax.random.split(key)
    x = jax.random.normal(kx, (n_rows, input_dim), jnp.float32)
    weights, biases = init_mlp_params(key, input_dim, hidden_dim,
                                      output_dim, num_layers)

    # One-time parameter prep (bf16 weights, (1, out) f32 biases), reused below.
    w_prep, b_prep = prepare_mlp_params(weights, biases)

    for sigmoid_output in (True, False):
        out = mlp_forward(x, w_prep, b_prep, sigmoid_output=sigmoid_output)
        out = jax.block_until_ready(out)
        assert out.shape == (n_rows, output_dim)
        assert out.dtype == x.dtype

        # Reference 1: bf16-matched operands (same rounding as the kernel),
        # f32 accumulation -> tight tolerance validates kernel structure.
        refm = x.astype(jnp.bfloat16)
        for i, (w, b) in enumerate(zip(weights, biases)):
            refm = jnp.dot(refm, w.astype(jnp.bfloat16),
                           preferred_element_type=jnp.float32) + b
            if i < num_layers - 1:
                refm = jnp.maximum(refm, 0.0).astype(jnp.bfloat16)
        if sigmoid_output:
            refm = jax.nn.sigmoid(refm)
        assert jnp.allclose(out, refm, atol=5e-3, rtol=5e-3), (
            "bf16-matched mismatch", float(jnp.max(jnp.abs(out - refm))))

        # Reference 2: pure f32 module semantics -> loose tolerance (bf16 cast).
        ref = x
        for i, (w, b) in enumerate(zip(weights, biases)):
            ref = ref @ w + b
            if i < num_layers - 1:
                ref = jnp.maximum(ref, 0.0)
        if sigmoid_output:
            ref = jax.nn.sigmoid(ref)
        assert jnp.allclose(out, ref, atol=1e-1, rtol=1e-1), (
            "f32-reference mismatch", float(jnp.max(jnp.abs(out - ref))))

    print("KERNEL_OK")
</pallas_src>

<mosaic_0001>
module attributes {stable_mosaic.version = 11 : i64} {
  func.func @_mlp_kernel(%arg0: i32, %arg1: memref<64x32xf32, #tpu.memory_space<vmem>>, %arg2: memref<32x64xbf16, #tpu.memory_space<vmem>>, %arg3: memref<1x64xf32, #tpu.memory_space<vmem>>, %arg4: memref<64x64xbf16, #tpu.memory_space<vmem>>, %arg5: memref<1x64xf32, #tpu.memory_space<vmem>>, %arg6: memref<64x16xbf16, #tpu.memory_space<vmem>>, %arg7: memref<1x16xf32, #tpu.memory_space<vmem>>, %arg8: memref<64x16xf32, #tpu.memory_space<vmem>>) attributes {dimension_semantics = [#tpu.dimension_semantics<parallel>], iteration_bounds = array<i64: 1>, scalar_prefetch = 0 : i64, scratch_operands = 0 : i64, tpu.core_type = #tpu.core_type<tc>, window_params = [{transform_indices = @transform_0, window_bounds = array<i64: 64, 32>}, {pipeline_mode = #tpu.pipeline_mode<synchronous>, transform_indices = @transform_1, window_bounds = array<i64: 32, 64>}, {pipeline_mode = #tpu.pipeline_mode<synchronous>, transform_indices = @transform_2, window_bounds = array<i64: 1, 64>}, {pipeline_mode = #tpu.pipeline_mode<synchronous>, transform_indices = @transform_3, window_bounds = array<i64: 64, 64>}, {pipeline_mode = #tpu.pipeline_mode<synchronous>, transform_indices = @transform_4, window_bounds = array<i64: 1, 64>}, {pipeline_mode = #tpu.pipeline_mode<synchronous>, transform_indices = @transform_5, window_bounds = array<i64: 64, 16>}, {pipeline_mode = #tpu.pipeline_mode<synchronous>, transform_indices = @transform_6, window_bounds = array<i64: 1, 16>}, {transform_indices = @transform_7, window_bounds = array<i64: 64, 16>}]} {
    %c0 = arith.constant 0 : index
    %c0_0 = arith.constant 0 : index
    %0 = vector.load %arg1[%c0, %c0_0] : memref<64x32xf32, #tpu.memory_space<vmem>>, vector<64x32xf32>
    %1 = arith.truncf %0 : vector<64x32xf32> to vector<64x32xbf16>
    %c0_1 = arith.constant 0 : index
    %c0_2 = arith.constant 0 : index
    %2 = vector.load %arg2[%c0_1, %c0_2] : memref<32x64xbf16, #tpu.memory_space<vmem>>, vector<32x64xbf16>
    %c0_3 = arith.constant 0 : index
    %c0_4 = arith.constant 0 : index
    %3 = vector.load %arg3[%c0_3, %c0_4] : memref<1x64xf32, #tpu.memory_space<vmem>>, vector<1x64xf32>
    %cst = arith.constant dense<0.000000e+00> : vector<64x64xf32>
    %4 = tpu.matmul %1, %2, %cst {dimension_numbers = #tpu.dot_dimension_numbers<[1], [0], [0], [1], [0, 0, 1, 1], [], []>} : vector<64x32xbf16>, vector<32x64xbf16>, vector<64x64xf32> -> vector<64x64xf32>
    %5 = vector.broadcast %3 : vector<1x64xf32> to vector<64x64xf32>
    %6 = arith.addf %4, %5 : vector<64x64xf32>
    %cst_5 = arith.constant 0.000000e+00 : f32
    %7 = vector.broadcast %cst_5 : f32 to vector<64x64xf32>
    %8 = arith.maximumf %6, %7 : vector<64x64xf32>
    %9 = arith.truncf %8 : vector<64x64xf32> to vector<64x64xbf16>
    %c0_6 = arith.constant 0 : index
    %c0_7 = arith.constant 0 : index
    %10 = vector.load %arg4[%c0_6, %c0_7] : memref<64x64xbf16, #tpu.memory_space<vmem>>, vector<64x64xbf16>
    %c0_8 = arith.constant 0 : index
    %c0_9 = arith.constant 0 : index
    %11 = vector.load %arg5[%c0_8, %c0_9] : memref<1x64xf32, #tpu.memory_space<vmem>>, vector<1x64xf32>
    %cst_10 = arith.constant dense<0.000000e+00> : vector<64x64xf32>
    %12 = tpu.matmul %9, %10, %cst_10 {dimension_numbers = #tpu.dot_dimension_numbers<[1], [0], [0], [1], [0, 0, 1, 1], [], []>} : vector<64x64xbf16>, vector<64x64xbf16>, vector<64x64xf32> -> vector<64x64xf32>
    %13 = vector.broadcast %11 : vector<1x64xf32> to vector<64x64xf32>
    %14 = arith.addf %12, %13 : vector<64x64xf32>
    %cst_11 = arith.constant 0.000000e+00 : f32
    %15 = vector.broadcast %cst_11 : f32 to vector<64x64xf32>
    %16 = arith.maximumf %14, %15 : vector<64x64xf32>
    %17 = arith.truncf %16 : vector<64x64xf32> to vector<64x64xbf16>
    %c0_12 = arith.constant 0 : index
    %c0_13 = arith.constant 0 : index
    %18 = vector.load %arg6[%c0_12, %c0_13] : memref<64x16xbf16, #tpu.memory_space<vmem>>, vector<64x16xbf16>
    %c0_14 = arith.constant 0 : index
    %c0_15 = arith.constant 0 : index
    %19 = vector.load %arg7[%c0_14, %c0_15] : memref<1x16xf32, #tpu.memory_space<vmem>>, vector<1x16xf32>
    %cst_16 = arith.constant dense<0.000000e+00> : vector<64x16xf32>
    %20 = tpu.matmul %17, %18, %cst_16 {dimension_numbers = #tpu.dot_dimension_numbers<[1], [0], [0], [1], [0, 0, 1, 1], [], []>} : vector<64x64xbf16>, vector<64x16xbf16>, vector<64x16xf32> -> vector<64x16xf32>
    %21 = vector.broadcast %19 : vector<1x16xf32> to vector<64x16xf32>
    %22 = arith.addf %20, %21 : vector<64x16xf32>
    %23 = arith.negf %22 : vector<64x16xf32>
    %24 = math.exp %23 : vector<64x16xf32>
    %cst_17 = arith.constant 1.000000e+00 : f32
    %25 = vector.broadcast %cst_17 : f32 to vector<64x16xf32>
    %26 = arith.addf %25, %24 : vector<64x16xf32>
    %27 = arith.divf %25, %26 : vector<64x16xf32>
    %c0_18 = arith.constant 0 : index
    %c0_19 = arith.constant 0 : index
    %28 = vector.load %arg8[%c0_18, %c0_19] : memref<64x16xf32, #tpu.memory_space<vmem>>, vector<64x16xf32>
    tpu.vector_store %arg8[%c0_18, %c0_19], %27 {strides = array<i32>} : memref<64x16xf32, #tpu.memory_space<vmem>>, vector<64x16xf32>,
    return
  }
  func.func @transform_0(%arg0: i32) -> (i32, i32) {
    %c0_i32 = arith.constant 0 : i32
    %c0_i32_0 = arith.constant 0 : i32
    return %arg0, %c0_i32 : i32, i32
  }
  func.func @transform_1(%arg0: i32) -> (i32, i32) {
    %c0_i32 = arith.constant 0 : i32
    %c0_i32_0 = arith.constant 0 : i32
    %c0_i32_1 = arith.constant 0 : i32
    return %c0_i32, %c0_i32_0 : i32, i32
  }
  func.func @transform_2(%arg0: i32) -> (i32, i32) {
    %c0_i32 = arith.constant 0 : i32
    %c0_i32_0 = arith.constant 0 : i32
    %c0_i32_1 = arith.constant 0 : i32
    return %c0_i32, %c0_i32_0 : i32, i32
  }
  func.func @transform_3(%arg0: i32) -> (i32, i32) {
    %c0_i32 = arith.constant 0 : i32
    %c0_i32_0 = arith.constant 0 : i32
    %c0_i32_1 = arith.constant 0 : i32
    return %c0_i32, %c0_i32_0 : i32, i32
  }
  func.func @transform_4(%arg0: i32) -> (i32, i32) {
    %c0_i32 = arith.constant 0 : i32
    %c0_i32_0 = arith.constant 0 : i32
    %c0_i32_1 = arith.constant 0 : i32
    return %c0_i32, %c0_i32_0 : i32, i32
  }
  func.func @transform_5(%arg0: i32) -> (i32, i32) {
    %c0_i32 = arith.constant 0 : i32
    %c0_i32_0 = arith.constant 0 : i32
    %c0_i32_1 = arith.constant 0 : i32
    return %c0_i32, %c0_i32_0 : i32, i32
  }
  func.func @transform_6(%arg0: i32) -> (i32, i32) {
    %c0_i32 = arith.constant 0 : i32
    %c0_i32_0 = arith.constant 0 : i32
    %c0_i32_1 = arith.constant 0 : i32
    return %c0_i32, %c0_i32_0 : i32, i32
  }
  func.func @transform_7(%arg0: i32) -> (i32, i32) {
    %c0_i32 = arith.constant 0 : i32
    %c0_i32_0 = arith.constant 0 : i32
    return %arg0, %c0_i32 : i32, i32
  }
}

module attributes {stable_mosaic.version = 11 : i64} {
  func.func @_mlp_kernel(%arg0: i32, %arg1: memref<64x32xf32, #tpu.memory_space<vmem>>, %arg2: memref<32x64xbf16, #tpu.memory_space<vmem>>, %arg3: memref<1x64xf32, #tpu.memory_space<vmem>>, %arg4: memref<64x64xbf16, #tpu.memory_space<vmem>>, %arg5: memref<1x64xf32, #tpu.memory_space<vmem>>, %arg6: memref<64x16xbf16, #tpu.memory_space<vmem>>, %arg7: memref<1x16xf32, #tpu.memory_space<vmem>>, %arg8: memref<64x16xf32, #tpu.memory_space<vmem>>) attributes {dimension_semantics = [#tpu.dimension_semantics<parallel>], iteration_bounds = array<i64: 1>, scalar_prefetch = 0 : i64, scratch_operands = 0 : i64, tpu.core_type = #tpu.core_type<tc>, window_params = [{transform_indices = @transform_0, window_bounds = array<i64: 64, 32>}, {pipeline_mode = #tpu.pipeline_mode<synchronous>, transform_indices = @transform_1, window_bounds = array<i64: 32, 64>}, {pipeline_mode = #tpu.pipeline_mode<synchronous>, transform_indices = @transform_2, window_bounds = array<i64: 1, 64>}, {pipeline_mode = #tpu.pipeline_mode<synchronous>, transform_indices = @transform_3, window_bounds = array<i64: 64, 64>}, {pipeline_mode = #tpu.pipeline_mode<synchronous>, transform_indices = @transform_4, window_bounds = array<i64: 1, 64>}, {pipeline_mode = #tpu.pipeline_mode<synchronous>, transform_indices = @transform_5, window_bounds = array<i64: 64, 16>}, {pipeline_mode = #tpu.pipeline_mode<synchronous>, transform_indices = @transform_6, window_bounds = array<i64: 1, 16>}, {transform_indices = @transform_7, window_bounds = array<i64: 64, 16>}]} {
    %c0 = arith.constant 0 : index
    %c0_0 = arith.constant 0 : index
    %0 = vector.load %arg1[%c0, %c0_0] : memref<64x32xf32, #tpu.memory_space<vmem>>, vector<64x32xf32>
    %1 = arith.truncf %0 : vector<64x32xf32> to vector<64x32xbf16>
    %c0_1 = arith.constant 0 : index
    %c0_2 = arith.constant 0 : index
    %2 = vector.load %arg2[%c0_1, %c0_2] : memref<32x64xbf16, #tpu.memory_space<vmem>>, vector<32x64xbf16>
    %c0_3 = arith.constant 0 : index
    %c0_4 = arith.constant 0 : index
    %3 = vector.load %arg3[%c0_3, %c0_4] : memref<1x64xf32, #tpu.memory_space<vmem>>, vector<1x64xf32>
    %cst = arith.constant dense<0.000000e+00> : vector<64x64xf32>
    %4 = tpu.matmul %1, %2, %cst {dimension_numbers = #tpu.dot_dimension_numbers<[1], [0], [0], [1], [0, 0, 1, 1], [], []>} : vector<64x32xbf16>, vector<32x64xbf16>, vector<64x64xf32> -> vector<64x64xf32>
    %5 = vector.broadcast %3 : vector<1x64xf32> to vector<64x64xf32>
    %6 = arith.addf %4, %5 : vector<64x64xf32>
    %cst_5 = arith.constant 0.000000e+00 : f32
    %7 = vector.broadcast %cst_5 : f32 to vector<64x64xf32>
    %8 = arith.maximumf %6, %7 : vector<64x64xf32>
    %9 = arith.truncf %8 : vector<64x64xf32> to vector<64x64xbf16>
    %c0_6 = arith.constant 0 : index
    %c0_7 = arith.constant 0 : index
    %10 = vector.load %arg4[%c0_6, %c0_7] : memref<64x64xbf16, #tpu.memory_space<vmem>>, vector<64x64xbf16>
    %c0_8 = arith.constant 0 : index
    %c0_9 = arith.constant 0 : index
    %11 = vector.load %arg5[%c0_8, %c0_9] : memref<1x64xf32, #tpu.memory_space<vmem>>, vector<1x64xf32>
    %cst_10 = arith.constant dense<0.000000e+00> : vector<64x64xf32>
    %12 = tpu.matmul %9, %10, %cst_10 {dimension_numbers = #tpu.dot_dimension_numbers<[1], [0], [0], [1], [0, 0, 1, 1], [], []>} : vector<64x64xbf16>, vector<64x64xbf16>, vector<64x64xf32> -> vector<64x64xf32>
    %13 = vector.broadcast %11 : vector<1x64xf32> to vector<64x64xf32>
    %14 = arith.addf %12, %13 : vector<64x64xf32>
    %cst_11 = arith.constant 0.000000e+00 : f32
    %15 = vector.broadcast %cst_11 : f32 to vector<64x64xf32>
    %16 = arith.maximumf %14, %15 : vector<64x64xf32>
    %17 = arith.truncf %16 : vector<64x64xf32> to vector<64x64xbf16>
    %c0_12 = arith.constant 0 : index
    %c0_13 = arith.constant 0 : index
    %18 = vector.load %arg6[%c0_12, %c0_13] : memref<64x16xbf16, #tpu.memory_space<vmem>>, vector<64x16xbf16>
    %c0_14 = arith.constant 0 : index
    %c0_15 = arith.constant 0 : index
    %19 = vector.load %arg7[%c0_14, %c0_15] : memref<1x16xf32, #tpu.memory_space<vmem>>, vector<1x16xf32>
    %cst_16 = arith.constant dense<0.000000e+00> : vector<64x16xf32>
    %20 = tpu.matmul %17, %18, %cst_16 {dimension_numbers = #tpu.dot_dimension_numbers<[1], [0], [0], [1], [0, 0, 1, 1], [], []>} : vector<64x64xbf16>, vector<64x16xbf16>, vector<64x16xf32> -> vector<64x16xf32>
    %21 = vector.broadcast %19 : vector<1x16xf32> to vector<64x16xf32>
    %22 = arith.addf %20, %21 : vector<64x16xf32>
    %23 = arith.negf %22 : vector<64x16xf32>
    %24 = math.exp %23 : vector<64x16xf32>
    %cst_17 = arith.constant 1.000000e+00 : f32
    %25 = vector.broadcast %cst_17 : f32 to vector<64x16xf32>
    %26 = arith.addf %25, %24 : vector<64x16xf32>
    %27 = arith.divf %25, %26 : vector<64x16xf32>
    %c0_18 = arith.constant 0 : index
    %c0_19 = arith.constant 0 : index
    %28 = vector.load %arg8[%c0_18, %c0_19] : memref<64x16xf32, #tpu.memory_space<vmem>>, vector<64x16xf32>
    tpu.vector_store %arg8[%c0_18, %c0_19], %27 {strides = array<i32>} : memref<64x16xf32, #tpu.memory_space<vmem>>, vector<64x16xf32>,
    return
  }
  func.func @transform_0(%arg0: i32) -> (i32, i32) {
    %c0_i32 = arith.constant 0 : i32
    %c0_i32_0 = arith.constant 0 : i32
    return %arg0, %c0_i32 : i32, i32
  }
  func.func @transform_1(%arg0: i32) -> (i32, i32) {
    %c0_i32 = arith.constant 0 : i32
    %c0_i32_0 = arith.constant 0 : i32
    %c0_i32_1 = arith.constant 0 : i32
    return %c0_i32, %c0_i32_0 : i32, i32
  }
  func.func @transform_2(%arg0: i32) -> (i32, i32) {
    %c0_i32 = arith.constant 0 : i32
    %c0_i32_0 = arith.constant 0 : i32
    %c0_i32_1 = arith.constant 0 : i32
    return %c0_i32, %c0_i32_0 : i32, i32
  }
  func.func @transform_3(%arg0: i32) -> (i32, i32) {
    %c0_i32 = arith.constant 0 : i32
    %c0_i32_0 = arith.constant 0 : i32
    %c0_i32_1 = arith.constant 0 : i32
    return %c0_i32, %c0_i32_0 : i32, i32
  }
  func.func @transform_4(%arg0: i32) -> (i32, i32) {
    %c0_i32 = arith.constant 0 : i32
    %c0_i32_0 = arith.constant 0 : i32
    %c0_i32_1 = arith.constant 0 : i32
    return %c0_i32, %c0_i32_0 : i32, i32
  }
  func.func @transform_5(%arg0: i32) -> (i32, i32) {
    %c0_i32 = arith.constant 0 : i32
    %c0_i32_0 = arith.constant 0 : i32
    %c0_i32_1 = arith.constant 0 : i32
    return %c0_i32, %c0_i32_0 : i32, i32
  }
  func.func @transform_6(%arg0: i32) -> (i32, i32) {
    %c0_i32 = arith.constant 0 : i32
    %c0_i32_0 = arith.constant 0 : i32
    %c0_i32_1 = arith.constant 0 : i32
    return %c0_i32, %c0_i32_0 : i32, i32
  }
  func.func @transform_7(%arg0: i32) -> (i32, i32) {
    %c0_i32 = arith.constant 0 : i32
    %c0_i32_0 = arith.constant 0 : i32
    return %arg0, %c0_i32 : i32, i32
  }
}

</mosaic_0001>

<bundles_post_ra>
// kernel: tpu_custom_call.1
= control target key start
LH: loop header
LB: loop body
LE: loop exit
PB: predicated region body
PF: predicated region fallthrough
CT: control target
= control target key end

     0   :  { %vm62_vm0 = vcmask 261120   ;;  %vm191_vm1 = vcmask 523264   ;;  %vm445_vm2 = vcmask 130048   ;;  %s746_s1 = inlined_call_operand.vmem [shape: bf16[32,64], index: 1, kind: input, shape index: {}]   ;;  %s747_s0 = inlined_call_operand.vmem [shape: f32[64,32], index: 0, kind: input, shape index: {}]   ;;  %s748_s3 = inlined_call_operand.vmem [shape: bf16[64,64], index: 3, kind: input, shape index: {}]   ;;  %s749_s5 = inlined_call_operand.vmem [shape: bf16[64,16], index: 5, kind: input, shape index: {}]   ;;  %s750_s2 = inlined_call_operand.vmem [shape: f32[1,64], index: 2, kind: input, shape index: {}]   ;;  %s751_s4 = inlined_call_operand.vmem [shape: f32[1,64], index: 4, kind: input, shape index: {}]   ;;  %s752_s6 = inlined_call_operand.vmem [shape: f32[1,16], index: 6, kind: input, shape index: {}]   ;;  %s753_s7 = inlined_call_operand.vmem [shape: f32[64,16], index: 7, kind: output, shape index: {}]  }
   0x1   :  { %v557_v0 = vld [vmem:[%s746_s1] sm:$0xff]   ;;  %v558_v1 = vld [vmem:[%s746_s1 + $0x8] sm:$0xff]   ;;  %v29_v5 = vld [vmem:[%s747_s0 + $0x10] sm:$0xff] }
   0x2   :  { %513 = vmatprep.subr.bf16.mxu0 %v557_v0  ;;  %v27_v2 = vld [vmem:[%s747_s0] sm:$0xff]  ;;  %v28_v3 = vld [vmem:[%s747_s0 + $0x8] sm:$0xff]  ;;  %v30_v6 = vld [vmem:[%s747_s0 + $0x18] sm:$0xff] }
   0x3   :  { %514 = vmatpush3.bf16.msra.mxu0 %v557_v0  ;;  %v35_v4 = vpack.c.bf16 %v28_v3, %v27_v2  ;;  %v31_v7 = vld [vmem:[%s747_s0 + $0x20] sm:$0xff]  ;;  %v32_v8 = vld [vmem:[%s747_s0 + $0x28] sm:$0xff]  ;;  %v36_v10 = vpack.c.bf16 %v30_v6, %v29_v5  ;;  %v33_v13 = vld [vmem:[%s747_s0 + $0x30] sm:$0xff] }
   0x4   :  { %515 = vmatprep.subr.bf16.mxu0 %v558_v1  ;;  %v559_v9 = vld [vmem:[%s748_s3] sm:$0xff]   ;;  %v560_v11 = vld [vmem:[%s748_s3 + $0x8] sm:$0xff]   ;;  %v37_v12 = vpack.c.bf16 %v32_v8, %v31_v7  ;;  %v34_v14 = vld [vmem:[%s747_s0 + $0x38] sm:$0xff] }
   0x5   :  { %517 = vmatprep.mubr.msk.bf16.mxu0 %vm62_vm0, %v35_v4  ;;  %525 = vmatprep.subr.bf16.mxu1 %v559_v9  ;;  %v38_v15 = vpack.c.bf16 %v34_v14, %v33_v13  ;;  %v561_v16 = vld [vmem:[%s748_s3 + $0x10] sm:$0xff]   ;;  %v562_v17 = vld [vmem:[%s748_s3 + $0x18] sm:$0xff]   ;;  %v563_v18 = vld [vmem:[%s749_s5] sm:$0xff]  }
   0x6   :  { %526 = vmatpush3.bf16.msra.mxu1 %v559_v9  ;;  %v564_v19 = vld [vmem:[%s749_s5 + $0x8] sm:$0xff]   ;;  %v458_v20 = vld [vmem:[%s750_s2] ss:$0 sm:$0xff]  ;;  %v565_v49 = vld [vmem:[%s749_s5 + $0x10] sm:$0xff]  }
   0x7   :  { %516 = vmatpush3.bf16.msra.mxu0 %v558_v1  ;;  %527 = vmatprep.subr.bf16.mxu1 %v560_v11  ;;  %v566_v50 = vld [vmem:[%s749_s5 + $0x18] sm:$0xff]   ;;  %v465_v51 = vld [vmem:[%s751_s4] ss:$0 sm:$0xff] }
   0x8   :  { %541 = vmatprep.subr.bf16.mxu0 %v563_v18 }
   0xa   :  { %518 = vmatmul.mubr.msk.bf16.vlgmr.msra.gmra.mrb[0].mxu0 %vm62_vm0, %v36_v10  ;;  %528 = vmatpush3.bf16.msra.mxu1 %v560_v11 }
   0xb   :  { %521 = vmatprep.mubr.msk.bf16.mxu0 %vm62_vm0, %v37_v12  ;;  %529 = vmatprep.subr.bf16.mxu1 %v561_v16 }
   0xc   :  { %542 = vmatpush3.bf16.msra.mxu0 %v563_v18 }
   0xd   :  { %543 = vmatprep.subr.bf16.mxu0 %v564_v19 }
   0xe   :  { %530 = vmatpush3.bf16.msra.mxu1 %v561_v16  ;;  %v474_v16 = vld [vmem:[%s752_s6] ss:$0 sm:$0xff] }
   0xf   :  { %531 = vmatprep.subr.bf16.mxu1 %v562_v17 }
  0x10   :  { %544 = vmatpush3.bf16.msra.mxu0 %v564_v19 }
  0x11   :  { %545 = vmatprep.subr.bf16.mxu0 %v565_v49 }
  0x12   :  { %522 = vmatmul.mubr.msk.bf16.gmra.mrb[4].mxu0 %vm62_vm0, %v38_v15  ;;  %532 = vmatpush3.bf16.msra.mxu1 %v562_v17 }
  0x14   :  { %546 = vmatpush3.bf16.msra.mxu0 %v565_v49 }
  0x15   :  { %547 = vmatprep.subr.bf16.mxu0 %v566_v50 }
  0x18   :  { %548 = vmatpush3.bf16.msra.mxu0 %v566_v50 }
  0xdd   :  { %v519_v21 = vpop.f32.mrb[0].mxu0 }
  0xde   :  { %v118_v22 = vadd.f32 %v519_v21, %v458_v20  ;;  %v109_v23 = vpop.f32.mrb[1].mxu0 }
  0xdf   :  { %v110_v24 = vadd.f32 %v458_v20, %v109_v23  ;;  %v520_v25 = vpop.f32.mrb[2].mxu0 }
  0xe0   :  { %v121_v26 = vadd.f32 %v520_v25, %v458_v20  ;;  %v112_v27 = vpop.f32.mrb[3].mxu0  ;;  %v142_v29 = vmax.f32 %v118_v22, 0.0 }
  0xe1   :  { %v113_v28 = vadd.f32 %v458_v20, %v112_v27  ;;  %v140_v31 = vmax.f32 %v110_v24, 0.0 }
  0xe2   :  { %v143_v30 = vmax.f32 %v121_v26, 0.0 }
  0xe3   :  { %v141_v32 = vmax.f32 %v113_v28, 0.0 }
  0xe4   :  { %v149_v33 = vpack.c.bf16 %v143_v30, %v142_v29 }
  0xe5   :  { %v523_v34 = vpop.f32.mrb[4].mxu0  ;;  %v148_v35 = vpack.c.bf16 %v141_v32, %v140_v31 }
  0xe6   :  { %v134_v36 = vadd.f32 %v523_v34, %v458_v20  ;;  %v125_v37 = vpop.f32.mrb[5].mxu0 }
  0xe7   :  { %v126_v38 = vadd.f32 %v458_v20, %v125_v37  ;;  %v524_v39 = vpop.f32.mrb[6].mxu0  ;;  %533 = vmatprep.mubr.msk.bf16.mxu1 %vm191_vm1, %v148_v35 }
  0xe8   :  { %v137_v40 = vadd.f32 %v524_v39, %v458_v20  ;;  %v128_v41 = vpop.f32.mrb[7].mxu0  ;;  %534 = vmatmul.mubr.msk.bf16.vlgmr.msra.gmra.mrb[0].mxu1 %vm191_vm1, %v149_v33  ;;  %v146_v43 = vmax.f32 %v134_v36, 0.0 }
  0xe9   :  { %v129_v42 = vadd.f32 %v458_v20, %v128_v41  ;;  %v144_v45 = vmax.f32 %v126_v38, 0.0 }
  0xea   :  { %v147_v44 = vmax.f32 %v137_v40, 0.0 }
  0xeb   :  { %v145_v46 = vmax.f32 %v129_v42, 0.0 }
  0xec   :  { %v151_v47 = vpack.c.bf16 %v147_v44, %v146_v43 }
  0xed   :  { %v150_v48 = vpack.c.bf16 %v145_v46, %v144_v45 }
  0xef   :  { %537 = vmatprep.mubr.msk.bf16.mxu1 %vm191_vm1, %v150_v48 }
  0xf0   :  { %538 = vmatmul.mubr.msk.bf16.gmra.mrb[4].mxu1 %vm191_vm1, %v151_v47 }
 0x1bb   :  { %v535_v52 = vpop.f32.mrb[0].mxu1 }
 0x1bc   :  { %v247_v53 = vadd.f32 %v535_v52, %v465_v51  ;;  %v238_v54 = vpop.f32.mrb[1].mxu1 }
 0x1bd   :  { %v239_v55 = vadd.f32 %v465_v51, %v238_v54  ;;  %v536_v56 = vpop.f32.mrb[2].mxu1 }
 0x1be   :  { %v250_v57 = vadd.f32 %v536_v56, %v465_v51  ;;  %v241_v58 = vpop.f32.mrb[3].mxu1  ;;  %v271_v60 = vmax.f32 %v247_v53, 0.0 }
 0x1bf   :  { %v242_v59 = vadd.f32 %v465_v51, %v241_v58  ;;  %v269_v62 = vmax.f32 %v239_v55, 0.0 }
 0x1c0   :  { %v272_v61 = vmax.f32 %v250_v57, 0.0 }
 0x1c1   :  { %v270_v63 = vmax.f32 %v242_v59, 0.0 }
 0x1c2   :  { %v278_v0 = vpack.c.bf16 %v272_v61, %v271_v60 }
 0x1c3   :  { %v277_v1 = vpack.c.bf16 %v270_v63, %v269_v62  ;;  %v539_v2 = vpop.f32.mrb[4].mxu1 }
 0x1c4   :  { %v263_v3 = vadd.f32 %v539_v2, %v465_v51  ;;  %v254_v4 = vpop.f32.mrb[5].mxu1 }
 0x1c5   :  { %v255_v5 = vadd.f32 %v465_v51, %v254_v4  ;;  %v540_v6 = vpop.f32.mrb[6].mxu1  ;;  %549 = vmatprep.mubr.msk.bf16.mxu0 %vm191_vm1, %v277_v1 }
 0x1c6   :  { %v266_v7 = vadd.f32 %v540_v6, %v465_v51  ;;  %v257_v8 = vpop.f32.mrb[7].mxu1  ;;  %550 = vmatmul.mubr.msk.bf16.vlgmr.msra.gmra.mrb[8].mxu0 %vm191_vm1, %v278_v0  ;;  %v275_v10 = vmax.f32 %v263_v3, 0.0 }
 0x1c7   :  { %v258_v9 = vadd.f32 %v465_v51, %v257_v8  ;;  %v273_v12 = vmax.f32 %v255_v5, 0.0 }
 0x1c8   :  { %v276_v11 = vmax.f32 %v266_v7, 0.0 }
 0x1c9   :  { %v274_v13 = vmax.f32 %v258_v9, 0.0 }
 0x1ca   :  { %v280_v14 = vpack.c.bf16 %v276_v11, %v275_v10 }
 0x1cb   :  { %v279_v15 = vpack.c.bf16 %v274_v13, %v273_v12 }
 0x1cd   :  { %553 = vmatprep.mubr.msk.bf16.mxu0 %vm191_vm1, %v279_v15 }
 0x1ce   :  { %554 = vmatmul.mubr.msk.bf16.gmra.mrb[12].mxu0 %vm191_vm1, %v280_v14 }
 0x299   :  { %v551_v17 = vpop.f32.mrb[8].mxu0 }
 0x29a   :  { %v375_v18 = vadd.f32 %v551_v17, %v474_v16  ;;  %v366_v19 = vpop.f32.mrb[9].mxu0 }
 0x29b   :  { %v367_v20 = vadd.f32 %v474_v16, %v366_v19  ;;  %v552_v21 = vpop.f32.mrb[10].mxu0 }
 0x29c   :  { %v485_v22 = vmul.f32 -1.442695, %v375_v18  ;;  %v378_v23 = vadd.f32 %v552_v21, %v474_v16  ;;  %v369_v24 = vpop.f32.mrb[11].mxu0 }
 0x29d   :  { %v483_v25 = vmul.f32 -1.442695, %v367_v20  ;;  %v370_v26 = vadd.f32 %v474_v16, %v369_v24 }
 0x29e   :  { %567 = vpow2.f32 %v485_v22  ;;  %v486_v27 = vmul.f32 -1.442695, %v378_v23 }
 0x29f   :  { %569 = vpow2.f32 %v483_v25  ;;  %v484_v28 = vmul.f32 -1.442695, %v370_v26 }
 0x2a0   :  { %571 = vpow2.f32 %v486_v27 }
 0x2a1   :  { %573 = vpow2.f32 %v484_v28  ;;  %v555_v29 = vpop.f32.mrb[12].mxu0 }
 0x2a2   :  { %v391_v30 = vadd.f32 %v555_v29, %v474_v16  ;;  %v382_v31 = vpop.f32.mrb[13].mxu0 }
 0x2a3   :  { %v383_v32 = vadd.f32 %v474_v16, %v382_v31  ;;  %v556_v33 = vpop.f32.mrb[14].mxu0 }
 0x2a4   :  { %v489_v34 = vmul.f32 -1.442695, %v391_v30  ;;  %v394_v35 = vadd.f32 %v556_v33, %v474_v16  ;;  %v385_v36 = vpop.f32.mrb[15].mxu0 }
 0x2a5   :  { %v487_v37 = vmul.f32 -1.442695, %v383_v32  ;;  %v386_v38 = vadd.f32 %v474_v16, %v385_v36 }
 0x2a6   :  { %575 = vpow2.f32 %v489_v34  ;;  %v490_v39 = vmul.f32 -1.442695, %v394_v35 }
 0x2a7   :  { %577 = vpow2.f32 %v487_v37  ;;  %v488_v40 = vmul.f32 -1.442695, %v386_v38 }
 0x2a8   :  { %v568_v41 = vpop.eup %567  ;;  %579 = vpow2.f32 %v490_v39 }
 0x2a9   :  { %v570_v42 = vpop.eup %569  ;;  %v423_v43 = vadd.f32 1.0, %v568_v41  ;;  %581 = vpow2.f32 %v488_v40 }
 0x2aa   :  { %v572_v44 = vpop.eup %571  ;;  %v421_v45 = vadd.f32 1.0, %v570_v42 }
 0x2ab   :  { %v574_v46 = vpop.eup %573  ;;  %583 = vrcp.f32 %v423_v43  ;;  %v424_v47 = vadd.f32 1.0, %v572_v44 }
 0x2ac   :  { %585 = vrcp.f32 %v421_v45  ;;  %v422_v48 = vadd.f32 1.0, %v574_v46 }
 0x2ad   :  { %587 = vrcp.f32 %v424_v47 }
 0x2ae   :  { %589 = vrcp.f32 %v422_v48 }
 0x2b0   :  { %v576_v49 = vpop.eup %575 }
 0x2b1   :  { %v578_v50 = vpop.eup %577  ;;  %v427_v51 = vadd.f32 1.0, %v576_v49 }
 0x2b2   :  { %v580_v52 = vpop.eup %579  ;;  %v425_v53 = vadd.f32 1.0, %v578_v50 }
 0x2b3   :  { %v582_v54 = vpop.eup %581  ;;  %591 = vrcp.f32 %v427_v51  ;;  %v428_v55 = vadd.f32 1.0, %v580_v52 }
 0x2b4   :  { %593 = vrcp.f32 %v425_v53  ;;  %v426_v56 = vadd.f32 1.0, %v582_v54 }
 0x2b5   :  { %v584_v57 = vpop.eup %583  ;;  %595 = vrcp.f32 %v428_v55 }
 0x2b6   :  { %v586_v58 = vpop.eup %585  ;;  %448 = vst.msk [vmem:[%s753_s7 + $0x10] sm:$0xff] %vm445_vm2, %v584_v57  ;;  %597 = vrcp.f32 %v426_v56 }
 0x2b7   :  { %v588_v59 = vpop.eup %587  ;;  %446 = vst.msk [vmem:[%s753_s7] sm:$0xff] %vm445_vm2, %v586_v58 }
 0x2b8   :  { %v590_v60 = vpop.eup %589  ;;  %449 = vst.msk [vmem:[%s753_s7 + $0x18] sm:$0xff] %vm445_vm2, %v588_v59 }
 0x2b9   :  { %447 = vst.msk [vmem:[%s753_s7 + $0x8] sm:$0xff] %vm445_vm2, %v590_v60 }
 0x2bd   :  { %v592_v61 = vpop.eup %591 }
 0x2be   :  { %v594_v62 = vpop.eup %593  ;;  %452 = vst.msk [vmem:[%s753_s7 + $0x30] sm:$0xff] %vm445_vm2, %v592_v61 }
 0x2bf   :  { %v596_v63 = vpop.eup %595  ;;  %450 = vst.msk [vmem:[%s753_s7 + $0x20] sm:$0xff] %vm445_vm2, %v594_v62 }
 0x2c0   :  { %v598_v0 = vpop.eup %597  ;;  %453 = vst.msk [vmem:[%s753_s7 + $0x38] sm:$0xff] %vm445_vm2, %v596_v63 }
 0x2c1   :  { %451 = vst.msk [vmem:[%s753_s7 + $0x28] sm:$0xff] %vm445_vm2, %v598_v0 }

// kernel: tpu_custom_call.1
= control target key start
LH: loop header
LB: loop body
LE: loop exit
PB: predicated region body
PF: predicated region fallthrough
CT: control target
= control target key end

     0   :  { %vm62_vm0 = vcmask 261120   ;;  %vm191_vm1 = vcmask 523264   ;;  %vm445_vm2 = vcmask 130048   ;;  %s746_s1 = inlined_call_operand.vmem [shape: bf16[32,64], index: 1, kind: input, shape index: {}]   ;;  %s747_s0 = inlined_call_operand.vmem [shape: f32[64,32], index: 0, kind: input, shape index: {}]   ;;  %s748_s3 = inlined_call_operand.vmem [shape: bf16[64,64], index: 3, kind: input, shape index: {}]   ;;  %s749_s5 = inlined_call_operand.vmem [shape: bf16[64,16], index: 5, kind: input, shape index: {}]   ;;  %s750_s2 = inlined_call_operand.vmem [shape: f32[1,64], index: 2, kind: input, shape index: {}]   ;;  %s751_s4 = inlined_call_operand.vmem [shape: f32[1,64], index: 4, kind: input, shape index: {}]   ;;  %s752_s6 = inlined_call_operand.vmem [shape: f32[1,16], index: 6, kind: input, shape index: {}]   ;;  %s753_s7 = inlined_call_operand.vmem [shape: f32[64,16], index: 7, kind: output, shape index: {}]  }
   0x1   :  { %v557_v0 = vld [vmem:[%s746_s1] sm:$0xff]   ;;  %v558_v1 = vld [vmem:[%s746_s1 + $0x8] sm:$0xff]   ;;  %v29_v5 = vld [vmem:[%s747_s0 + $0x10] sm:$0xff] }
   0x2   :  { %513 = vmatprep.subr.bf16.mxu0 %v557_v0  ;;  %v27_v2 = vld [vmem:[%s747_s0] sm:$0xff]  ;;  %v28_v3 = vld [vmem:[%s747_s0 + $0x8] sm:$0xff]  ;;  %v30_v6 = vld [vmem:[%s747_s0 + $0x18] sm:$0xff] }
   0x3   :  { %514 = vmatpush3.bf16.msra.mxu0 %v557_v0  ;;  %v35_v4 = vpack.c.bf16 %v28_v3, %v27_v2  ;;  %v31_v7 = vld [vmem:[%s747_s0 + $0x20] sm:$0xff]  ;;  %v32_v8 = vld [vmem:[%s747_s0 + $0x28] sm:$0xff]  ;;  %v36_v10 = vpack.c.bf16 %v30_v6, %v29_v5  ;;  %v33_v13 = vld [vmem:[%s747_s0 + $0x30] sm:$0xff] }
   0x4   :  { %515 = vmatprep.subr.bf16.mxu0 %v558_v1  ;;  %v559_v9 = vld [vmem:[%s748_s3] sm:$0xff]   ;;  %v560_v11 = vld [vmem:[%s748_s3 + $0x8] sm:$0xff]   ;;  %v37_v12 = vpack.c.bf16 %v32_v8, %v31_v7  ;;  %v34_v14 = vld [vmem:[%s747_s0 + $0x38] sm:$0xff] }
   0x5   :  { %517 = vmatprep.mubr.msk.bf16.mxu0 %vm62_vm0, %v35_v4  ;;  %525 = vmatprep.subr.bf16.mxu1 %v559_v9  ;;  %v38_v15 = vpack.c.bf16 %v34_v14, %v33_v13  ;;  %v561_v16 = vld [vmem:[%s748_s3 + $0x10] sm:$0xff]   ;;  %v562_v17 = vld [vmem:[%s748_s3 + $0x18] sm:$0xff]   ;;  %v563_v18 = vld [vmem:[%s749_s5] sm:$0xff]  }
   0x6   :  { %526 = vmatpush3.bf16.msra.mxu1 %v559_v9  ;;  %v564_v19 = vld [vmem:[%s749_s5 + $0x8] sm:$0xff]   ;;  %v458_v20 = vld [vmem:[%s750_s2] ss:$0 sm:$0xff]  ;;  %v565_v49 = vld [vmem:[%s749_s5 + $0x10] sm:$0xff]  }
   0x7   :  { %516 = vmatpush3.bf16.msra.mxu0 %v558_v1  ;;  %527 = vmatprep.subr.bf16.mxu1 %v560_v11  ;;  %v566_v50 = vld [vmem:[%s749_s5 + $0x18] sm:$0xff]   ;;  %v465_v51 = vld [vmem:[%s751_s4] ss:$0 sm:$0xff] }
   0x8   :  { %541 = vmatprep.subr.bf16.mxu0 %v563_v18 }
   0xa   :  { %518 = vmatmul.mubr.msk.bf16.vlgmr.msra.gmra.mrb[0].mxu0 %vm62_vm0, %v36_v10  ;;  %528 = vmatpush3.bf16.msra.mxu1 %v560_v11 }
   0xb   :  { %521 = vmatprep.mubr.msk.bf16.mxu0 %vm62_vm0, %v37_v12  ;;  %529 = vmatprep.subr.bf16.mxu1 %v561_v16 }
   0xc   :  { %542 = vmatpush3.bf16.msra.mxu0 %v563_v18 }
   0xd   :  { %543 = vmatprep.subr.bf16.mxu0 %v564_v19 }
   0xe   :  { %530 = vmatpush3.bf16.msra.mxu1 %v561_v16  ;;  %v474_v16 = vld [vmem:[%s752_s6] ss:$0 sm:$0xff] }
   0xf   :  { %531 = vmatprep.subr.bf16.mxu1 %v562_v17 }
  0x10   :  { %544 = vmatpush3.bf16.msra.mxu0 %v564_v19 }
  0x11   :  { %545 = vmatprep.subr.bf16.mxu0 %v565_v49 }
  0x12   :  { %522 = vmatmul.mubr.msk.bf16.gmra.mrb[4].mxu0 %vm62_vm0, %v38_v15  ;;  %532 = vmatpush3.bf16.msra.mxu1 %v562_v17 }
  0x14   :  { %546 = vmatpush3.bf16.msra.mxu0 %v565_v49 }
  0x15   :  { %547 = vmatprep.subr.bf16.mxu0 %v566_v50 }
  0x18   :  { %548 = vmatpush3.bf16.msra.mxu0 %v566_v50 }
  0xdd   :  { %v519_v21 = vpop.f32.mrb[0].mxu0 }
  0xde   :  { %v118_v22 = vadd.f32 %v519_v21, %v458_v20  ;;  %v109_v23 = vpop.f32.mrb[1].mxu0 }
  0xdf   :  { %v110_v24 = vadd.f32 %v458_v20, %v109_v23  ;;  %v520_v25 = vpop.f32.mrb[2].mxu0 }
  0xe0   :  { %v121_v26 = vadd.f32 %v520_v25, %v458_v20  ;;  %v112_v27 = vpop.f32.mrb[3].mxu0  ;;  %v142_v29 = vmax.f32 %v118_v22, 0.0 }
  0xe1   :  { %v113_v28 = vadd.f32 %v458_v20, %v112_v27  ;;  %v140_v31 = vmax.f32 %v110_v24, 0.0 }
  0xe2   :  { %v143_v30 = vmax.f32 %v121_v26, 0.0 }
  0xe3   :  { %v141_v32 = vmax.f32 %v113_v28, 0.0 }
  0xe4   :  { %v149_v33 = vpack.c.bf16 %v143_v30, %v142_v29 }
  0xe5   :  { %v523_v34 = vpop.f32.mrb[4].mxu0  ;;  %v148_v35 = vpack.c.bf16 %v141_v32, %v140_v31 }
  0xe6   :  { %v134_v36 = vadd.f32 %v523_v34, %v458_v20  ;;  %v125_v37 = vpop.f32.mrb[5].mxu0 }
  0xe7   :  { %v126_v38 = vadd.f32 %v458_v20, %v125_v37  ;;  %v524_v39 = vpop.f32.mrb[6].mxu0  ;;  %533 = vmatprep.mubr.msk.bf16.mxu1 %vm191_vm1, %v148_v35 }
  0xe8   :  { %v137_v40 = vadd.f32 %v524_v39, %v458_v20  ;;  %v128_v41 = vpop.f32.mrb[7].mxu0  ;;  %534 = vmatmul.mubr.msk.bf16.vlgmr.msra.gmra.mrb[0].mxu1 %vm191_vm1, %v149_v33  ;;  %v146_v43 = vmax.f32 %v134_v36, 0.0 }
  0xe9   :  { %v129_v42 = vadd.f32 %v458_v20, %v128_v41  ;;  %v144_v45 = vmax.f32 %v126_v38, 0.0 }
  0xea   :  { %v147_v44 = vmax.f32 %v137_v40, 0.0 }
  0xeb   :  { %v145_v46 = vmax.f32 %v129_v42, 0.0 }
  0xec   :  { %v151_v47 = vpack.c.bf16 %v147_v44, %v146_v43 }
  0xed   :  { %v150_v48 = vpack.c.bf16 %v145_v46, %v144_v45 }
  0xef   :  { %537 = vmatprep.mubr.msk.bf16.mxu1 %vm191_vm1, %v150_v48 }
  0xf0   :  { %538 = vmatmul.mubr.msk.bf16.gmra.mrb[4].mxu1 %vm191_vm1, %v151_v47 }
 0x1bb   :  { %v535_v52 = vpop.f32.mrb[0].mxu1 }
 0x1bc   :  { %v247_v53 = vadd.f32 %v535_v52, %v465_v51  ;;  %v238_v54 = vpop.f32.mrb[1].mxu1 }
 0x1bd   :  { %v239_v55 = vadd.f32 %v465_v51, %v238_v54  ;;  %v536_v56 = vpop.f32.mrb[2].mxu1 }
 0x1be   :  { %v250_v57 = vadd.f32 %v536_v56, %v465_v51  ;;  %v241_v58 = vpop.f32.mrb[3].mxu1  ;;  %v271_v60 = vmax.f32 %v247_v53, 0.0 }
 0x1bf   :  { %v242_v59 = vadd.f32 %v465_v51, %v241_v58  ;;  %v269_v62 = vmax.f32 %v239_v55, 0.0 }
 0x1c0   :  { %v272_v61 = vmax.f32 %v250_v57, 0.0 }
 0x1c1   :  { %v270_v63 = vmax.f32 %v242_v59, 0.0 }
 0x1c2   :  { %v278_v0 = vpack.c.bf16 %v272_v61, %v271_v60 }
 0x1c3   :  { %v277_v1 = vpack.c.bf16 %v270_v63, %v269_v62  ;;  %v539_v2 = vpop.f32.mrb[4].mxu1 }
 0x1c4   :  { %v263_v3 = vadd.f32 %v539_v2, %v465_v51  ;;  %v254_v4 = vpop.f32.mrb[5].mxu1 }
 0x1c5   :  { %v255_v5 = vadd.f32 %v465_v51, %v254_v4  ;;  %v540_v6 = vpop.f32.mrb[6].mxu1  ;;  %549 = vmatprep.mubr.msk.bf16.mxu0 %vm191_vm1, %v277_v1 }
 0x1c6   :  { %v266_v7 = vadd.f32 %v540_v6, %v465_v51  ;;  %v257_v8 = vpop.f32.mrb[7].mxu1  ;;  %550 = vmatmul.mubr.msk.bf16.vlgmr.msra.gmra.mrb[8].mxu0 %vm191_vm1, %v278_v0  ;;  %v275_v10 = vmax.f32 %v263_v3, 0.0 }
 0x1c7   :  { %v258_v9 = vadd.f32 %v465_v51, %v257_v8  ;;  %v273_v12 = vmax.f32 %v255_v5, 0.0 }
 0x1c8   :  { %v276_v11 = vmax.f32 %v266_v7, 0.0 }
 0x1c9   :  { %v274_v13 = vmax.f32 %v258_v9, 0.0 }
 0x1ca   :  { %v280_v14 = vpack.c.bf16 %v276_v11, %v275_v10 }
 0x1cb   :  { %v279_v15 = vpack.c.bf16 %v274_v13, %v273_v12 }
 0x1cd   :  { %553 = vmatprep.mubr.msk.bf16.mxu0 %vm191_vm1, %v279_v15 }
 0x1ce   :  { %554 = vmatmul.mubr.msk.bf16.gmra.mrb[12].mxu0 %vm191_vm1, %v280_v14 }
 0x299   :  { %v551_v17 = vpop.f32.mrb[8].mxu0 }
 0x29a   :  { %v375_v18 = vadd.f32 %v551_v17, %v474_v16  ;;  %v366_v19 = vpop.f32.mrb[9].mxu0 }
 0x29b   :  { %v367_v20 = vadd.f32 %v474_v16, %v366_v19  ;;  %v552_v21 = vpop.f32.mrb[10].mxu0 }
 0x29c   :  { %v485_v22 = vmul.f32 -1.442695, %v375_v18  ;;  %v378_v23 = vadd.f32 %v552_v21, %v474_v16  ;;  %v369_v24 = vpop.f32.mrb[11].mxu0 }
 0x29d   :  { %v483_v25 = vmul.f32 -1.442695, %v367_v20  ;;  %v370_v26 = vadd.f32 %v474_v16, %v369_v24 }
 0x29e   :  { %567 = vpow2.f32 %v485_v22  ;;  %v486_v27 = vmul.f32 -1.442695, %v378_v23 }
 0x29f   :  { %569 = vpow2.f32 %v483_v25  ;;  %v484_v28 = vmul.f32 -1.442695, %v370_v26 }
 0x2a0   :  { %571 = vpow2.f32 %v486_v27 }
 0x2a1   :  { %573 = vpow2.f32 %v484_v28  ;;  %v555_v29 = vpop.f32.mrb[12].mxu0 }
 0x2a2   :  { %v391_v30 = vadd.f32 %v555_v29, %v474_v16  ;;  %v382_v31 = vpop.f32.mrb[13].mxu0 }
 0x2a3   :  { %v383_v32 = vadd.f32 %v474_v16, %v382_v31  ;;  %v556_v33 = vpop.f32.mrb[14].mxu0 }
 0x2a4   :  { %v489_v34 = vmul.f32 -1.442695, %v391_v30  ;;  %v394_v35 = vadd.f32 %v556_v33, %v474_v16  ;;  %v385_v36 = vpop.f32.mrb[15].mxu0 }
 0x2a5   :  { %v487_v37 = vmul.f32 -1.442695, %v383_v32  ;;  %v386_v38 = vadd.f32 %v474_v16, %v385_v36 }
 0x2a6   :  { %575 = vpow2.f32 %v489_v34  ;;  %v490_v39 = vmul.f32 -1.442695, %v394_v35 }
 0x2a7   :  { %577 = vpow2.f32 %v487_v37  ;;  %v488_v40 = vmul.f32 -1.442695, %v386_v38 }
 0x2a8   :  { %v568_v41 = vpop.eup %567  ;;  %579 = vpow2.f32 %v490_v39 }
 0x2a9   :  { %v570_v42 = vpop.eup %569  ;;  %v423_v43 = vadd.f32 1.0, %v568_v41  ;;  %581 = vpow2.f32 %v488_v40 }
 0x2aa   :  { %v572_v44 = vpop.eup %571  ;;  %v421_v45 = vadd.f32 1.0, %v570_v42 }
 0x2ab   :  { %v574_v46 = vpop.eup %573  ;;  %583 = vrcp.f32 %v423_v43  ;;  %v424_v47 = vadd.f32 1.0, %v572_v44 }
 0x2ac   :  { %585 = vrcp.f32 %v421_v45  ;;  %v422_v48 = vadd.f32 1.0, %v574_v46 }
 0x2ad   :  { %587 = vrcp.f32 %v424_v47 }
 0x2ae   :  { %589 = vrcp.f32 %v422_v48 }
 0x2b0   :  { %v576_v49 = vpop.eup %575 }
 0x2b1   :  { %v578_v50 = vpop.eup %577  ;;  %v427_v51 = vadd.f32 1.0, %v576_v49 }
 0x2b2   :  { %v580_v52 = vpop.eup %579  ;;  %v425_v53 = vadd.f32 1.0, %v578_v50 }
 0x2b3   :  { %v582_v54 = vpop.eup %581  ;;  %591 = vrcp.f32 %v427_v51  ;;  %v428_v55 = vadd.f32 1.0, %v580_v52 }
 0x2b4   :  { %593 = vrcp.f32 %v425_v53  ;;  %v426_v56 = vadd.f32 1.0, %v582_v54 }
 0x2b5   :  { %v584_v57 = vpop.eup %583  ;;  %595 = vrcp.f32 %v428_v55 }
 0x2b6   :  { %v586_v58 = vpop.eup %585  ;;  %448 = vst.msk [vmem:[%s753_s7 + $0x10] sm:$0xff] %vm445_vm2, %v584_v57  ;;  %597 = vrcp.f32 %v426_v56 }
 0x2b7   :  { %v588_v59 = vpop.eup %587  ;;  %446 = vst.msk [vmem:[%s753_s7] sm:$0xff] %vm445_vm2, %v586_v58 }
 0x2b8   :  { %v590_v60 = vpop.eup %589  ;;  %449 = vst.msk [vmem:[%s753_s7 + $0x18] sm:$0xff] %vm445_vm2, %v588_v59 }
 0x2b9   :  { %447 = vst.msk [vmem:[%s753_s7 + $0x8] sm:$0xff] %vm445_vm2, %v590_v60 }
 0x2bd   :  { %v592_v61 = vpop.eup %591 }
 0x2be   :  { %v594_v62 = vpop.eup %593  ;;  %452 = vst.msk [vmem:[%s753_s7 + $0x30] sm:$0xff] %vm445_vm2, %v592_v61 }
 0x2bf   :  { %v596_v63 = vpop.eup %595  ;;  %450 = vst.msk [vmem:[%s753_s7 + $0x20] sm:$0xff] %vm445_vm2, %v594_v62 }
 0x2c0   :  { %v598_v0 = vpop.eup %597  ;;  %453 = vst.msk [vmem:[%s753_s7 + $0x38] sm:$0xff] %vm445_vm2, %v596_v63 }
 0x2c1   :  { %451 = vst.msk [vmem:[%s753_s7 + $0x28] sm:$0xff] %vm445_vm2, %v598_v0 }

</bundles_post_ra>
